<compile_context>
chip_gen: v7x
topology: tpu7x:2x2x1
jax: 0.10.0
libtpu: 0.0.40
codegen_flags: <defaults>
</compile_context>

<pallas_src>
import jax
import jax.numpy as jnp
from jax.experimental import pallas as pl
from jax.experimental.pallas import tpu as pltpu


# ----------------------------- elementwise math -----------------------------

def _fastgelu_f32(x):
    # sigmoid(1.702*x)*x, via sigmoid(z) = 0.5*(tanh(z/2)+1):
    # a single EUP transcendental per element (tanh), extra mul/add on the VPU.
    return 0.5 * x * (jnp.tanh(0.851 * x) + 1.0)


def _gelu_tanh_f32(x):
    return 0.5 * x * (1.0 + jnp.tanh(x * 0.7978845608 * (1.0 + 0.044715 * x * x)))


def _make_kernel(math_fn):
    def kernel(x_ref, o_ref):
        x = x_ref[...].astype(jnp.float32)  # compute in f32, store at input width
        o_ref[...] = math_fn(x).astype(o_ref.dtype)
    return kernel


_fastgelu_kernel = _make_kernel(_fastgelu_f32)
_gelu_tanh_kernel = _make_kernel(_gelu_tanh_f32)


# ----------------------------- tiling heuristics -----------------------------

def _choose_slab(n):
    """Pick the widest lane-multiple column count that divides n (no padding)."""
    for cols in (1024, 512, 256, 128):
        if n % cols == 0:
            return n // cols, cols
    return None


def _chip_config():
    """Return (target_block_bytes, vmem_limit_bytes_or_None, num_tensorcores)."""
    kind = ""
    try:
        kind = jax.devices()[0].device_kind.lower()
    except Exception:
        pass
    vmem_bytes = None
    try:
        vmem_bytes = int(pltpu.get_tpu_info().vmem_capacity_bytes)
    except Exception:
        pass
    if ("v7" in kind or "7x" in kind
            or (vmem_bytes is not None and vmem_bytes <= (64 << 20))):
        # v7x: 3.2 TB/s HBM -> need big blocks to amortize the ~0.35us/step
        # overhead; 4 x 8 MiB = 32 MiB == default scoped limit, so raise it.
        return 8 << 20, 40 << 20, 2
    if "v6" in kind:
        # 4 x 6 MiB = 24 MiB < 32 MiB default scoped limit.
        return 6 << 20, None, 1
    if "v5" in kind:
        # 4 x 3 MiB = 12 MiB < 16 MiB default scoped limit; bigger buys ~nothing
        # at 0.82 TB/s.
        return 3 << 20, None, 1
    return 2 << 20, None, 1


# --------------------------------- launcher ----------------------------------

def _run_elementwise(kernel, math_fn, x):
    orig_shape = x.shape
    dtype = x.dtype
    n = x.size
    if n == 0:
        return x
    itemsize = jnp.dtype(dtype).itemsize
    # Native sublane tile for the dtype: f32 -> 8, bf16 -> 16, int8/fp8 -> 32.
    sub = 8 * max(1, 4 // itemsize)

    flat = x.reshape(-1)
    tail = None
    slab = _choose_slab(n)
    if slab is None:
        # Ragged: run the kernel on the 128-aligned prefix; the (<128 elem)
        # tail is handled in plain jnp (no full-tensor pad/slice round trips).
        n_main = (n // 128) * 128
        if n_main == 0:
            y = math_fn(flat.astype(jnp.float32)).astype(dtype)
            return y.reshape(orig_shape)
        tail = flat[n_main:]
        flat = flat[:n_main]
        slab = _choose_slab(n_main)
    rows, cols = slab
    x2d = flat.reshape(rows, cols)

    target_block_bytes, vmem_limit, num_cores = _chip_config()

    # Block row count from the per-chip byte budget, aligned to the sublane tile.
    row_bytes = cols * itemsize
    tm = max(1, target_block_bytes // row_bytes)
    tm = max(sub, (tm // sub) * sub)
    tm = min(tm, rows)

    # Want >= 2 grid steps whenever the tensor is big enough (pipelining);
    # on 2-TC chips (v7x) prefer an even step count so both cores stay busy.
    steps = pl.cdiv(rows, tm)
    if steps < 2 and rows >= 2 * sub:
        steps = 2
    if num_cores == 2 and steps % 2 == 1 and rows >= (steps + 1) * sub:
        steps += 1
    if steps != pl.cdiv(rows, tm):
        tm = min(rows, ((pl.cdiv(rows, steps) + sub - 1) // sub) * sub)
    grid = (pl.cdiv(rows, tm),)  # partial tail block handled by Pallas

    compiler_params = pltpu.CompilerParams(
        dimension_semantics=("parallel",),
        vmem_limit_bytes=vmem_limit,
    )
    cost = pl.CostEstimate(
        flops=8 * rows * cols,
        transcendentals=rows * cols,
        bytes_accessed=2 * rows * cols * itemsize,
    )

    out2d = pl.pallas_call(
        kernel,
        out_shape=jax.ShapeDtypeStruct((rows, cols), dtype),
        grid_spec=pltpu.PrefetchScalarGridSpec(
            num_scalar_prefetch=0,
            grid=grid,
            in_specs=[pl.BlockSpec((tm, cols), lambda i: (i, 0))],
            out_specs=pl.BlockSpec((tm, cols), lambda i: (i, 0)),
        ),
        compiler_params=compiler_params,
        cost_estimate=cost,
    )(x2d)

    out_flat = out2d.reshape(-1)
    if tail is not None:
        tail_out = math_fn(tail.astype(jnp.float32)).astype(dtype)
        out_flat = jnp.concatenate([out_flat, tail_out])
    return out_flat.reshape(orig_shape)


class GELUActivation:
    """JAX/Pallas port of the PyTorch GELUActivation module."""

    def __init__(self, use_aprox: bool = True):
        self.use_aprox = use_aprox

    def __call__(self, x):
        if self.use_aprox:
            return _run_elementwise(_fastgelu_kernel, _fastgelu_f32, x)
        else:
            return _run_elementwise(_gelu_tanh_kernel, _gelu_tanh_f32, x)


# ---------------------------------- tests ------------------------------------

def _ref_fastgelu(x):
    return jax.nn.sigmoid(1.702 * x) * x


def _ref_gelu(x):
    return 0.5 * x * (1.0 + jnp.tanh(x * 0.7978845608 * (1.0 + 0.044715 * x * x)))


if __name__ == "__main__":
    key = jax.random.PRNGKey(0)
    # NCHW input, consistent with PyTorch conv-style tensors.
    x = jax.random.normal(key, (2, 4, 16, 16), dtype=jnp.float32)

    # Default module (use_aprox=True) -> fastgelu
    mod_fast = GELUActivation(use_aprox=True)
    y_fast = jax.block_until_ready(mod_fast(x))
    ref_fast = _ref_fastgelu(x)
    assert y_fast.shape == x.shape and y_fast.dtype == x.dtype
    assert jnp.allclose(y_fast, ref_fast, atol=2e-5, rtol=2e-5)

    # tanh variant (use_aprox=False)
    mod_exact = GELUActivation(use_aprox=False)
    y_exact = jax.block_until_ready(mod_exact(x))
    ref_exact = _ref_gelu(x)
    assert jnp.allclose(y_exact, ref_exact, atol=2e-5, rtol=2e-5)

    # bf16 + multi-block path (exercises the >=2-step tiling logic).
    xb = jax.random.normal(jax.random.PRNGKey(1), (3, 5, 24, 128), dtype=jnp.bfloat16)
    yb = jax.block_until_ready(mod_fast(xb))
    assert yb.shape == xb.shape and yb.dtype == xb.dtype
    assert jnp.allclose(yb.astype(jnp.float32),
                        _ref_fastgelu(xb.astype(jnp.float32)),
                        atol=2e-2, rtol=2e-2)

    # Ragged shape (not a multiple of 128): prefix kernel + jnp tail path.
    xr = jax.random.normal(jax.random.PRNGKey(2), (3, 131), dtype=jnp.float32)
    yr = jax.block_until_ready(mod_fast(xr))
    assert yr.shape == xr.shape and yr.dtype == xr.dtype
    assert jnp.allclose(yr, _ref_fastgelu(xr), atol=2e-5, rtol=2e-5)

    print("KERNEL_OK")
</pallas_src>

<mosaic_0001>
module attributes {stable_mosaic.version = 11 : i64} {
  func.func @kernel(%arg0: i32, %arg1: memref<2x1024xf32, #tpu.memory_space<vmem>>, %arg2: memref<2x1024xf32, #tpu.memory_space<vmem>>) attributes {dimension_semantics = [#tpu.dimension_semantics<parallel>], iteration_bounds = array<i64: 1>, scalar_prefetch = 0 : i64, scratch_operands = 0 : i64, tpu.core_type = #tpu.core_type<tc>, window_params = [{transform_indices = @transform_0, window_bounds = array<i64: 2, 1024>}, {transform_indices = @transform_1, window_bounds = array<i64: 2, 1024>}]} {
    %c0 = arith.constant 0 : index
    %c0_0 = arith.constant 0 : index
    %0 = vector.load %arg1[%c0, %c0_0] : memref<2x1024xf32, #tpu.memory_space<vmem>>, vector<2x1024xf32>
    %cst = arith.constant 5.000000e-01 : f32
    %1 = vector.broadcast %cst : f32 to vector<2x1024xf32>
    %2 = arith.mulf %1, %0 : vector<2x1024xf32>
    %cst_1 = arith.constant 8.510000e-01 : f32
    %3 = vector.broadcast %cst_1 : f32 to vector<2x1024xf32>
    %4 = arith.mulf %3, %0 : vector<2x1024xf32>
    %5 = math.tanh %4 : vector<2x1024xf32>
    %cst_2 = arith.constant 1.000000e+00 : f32
    %6 = vector.broadcast %cst_2 : f32 to vector<2x1024xf32>
    %7 = arith.addf %5, %6 : vector<2x1024xf32>
    %8 = arith.mulf %2, %7 : vector<2x1024xf32>
    %c0_3 = arith.constant 0 : index
    %c0_4 = arith.constant 0 : index
    %9 = vector.load %arg2[%c0_3, %c0_4] : memref<2x1024xf32, #tpu.memory_space<vmem>>, vector<2x1024xf32>
    tpu.vector_store %arg2[%c0_3, %c0_4], %8 {strides = array<i32>} : memref<2x1024xf32, #tpu.memory_space<vmem>>, vector<2x1024xf32>,
    return
  }
  func.func @transform_0(%arg0: i32) -> (i32, i32) {
    %c0_i32 = arith.constant 0 : i32
    %c0_i32_0 = arith.constant 0 : i32
    return %arg0, %c0_i32 : i32, i32
  }
  func.func @transform_1(%arg0: i32) -> (i32, i32) {
    %c0_i32 = arith.constant 0 : i32
    %c0_i32_0 = arith.constant 0 : i32
    return %arg0, %c0_i32 : i32, i32
  }
}

</mosaic_0001>

<bundles_post_ra>
// kernel: tpu_custom_call.1
= control target key start
LH: loop header
LB: loop body
LE: loop exit
PB: predicated region body
PF: predicated region fallthrough
CT: control target
= control target key end

     0   :  { %6 = vsyncpa [#allocation3], 0  ;;  %s140_s0 = inlined_call_operand.hbm [shape: f32[2,1024], index: 0, kind: input, shape index: {}]   ;;  %s141_s1 = inlined_call_operand.hbm [shape: f32[2,1024], index: 1, kind: output, shape index: {}]  }
   0x1   :  { %7 = vsyncpa [#allocation4], 0  ;;  %s104_s6 = smov [#allocation2]   ;;  %s56_s10 = scalar_lea.hbm %s140_s0, 256 }
   0x2   :  { %s14_s7 = sshll.u32 %s104_s6, 4  ;;  %p57_p0 = scmp.ne.s32.totalorder %s140_s0, %s56_s10  ;;  %s15_s7 = int_to_ptr.vmem [resolvable:$true] %s14_s7 }
   0x3   :  { %p60_p1 = scmp.lt.u32.totalorder %s56_s10, %s140_s0 }
   0x5   :  { %p62_p2 = pnand %p60_p1, %p57_p0 }
   0x7   :  { %65 = shalt.err (!%p62_p2)
}
   0x8   :  { %s66_s15 = scalar_lea.vmem %s15_s7, 256  ;;  %p71_p4 = scmp.lt.s32.totalorder %s15_s7, %s15_s7 }
   0x9   :  { %p67_p3 = scmp.ne.s32.totalorder %s15_s7, %s66_s15  ;;  %p72_p5 = scmp.lt.s32.totalorder %s66_s15, %s66_s15 }
   0xb   :  { %p73_p6 = por %p72_p5, %p71_p4 }
   0xd   :  { %p74_p7 = pnand %p73_p6, %p67_p3 }
   0xf   :  { %77 = shalt.err (!%p74_p7)
}
  0x10   :  { %17 = dma.hbm_to_vmem [thread:$0]  %s140_s0, 256, %s15_s7, [#allocation3]  }
  0x11   :  { %100 = dma.done.wait [#allocation3], 256  }
  0x12   :  { %101 = vsyncadd [#allocation3], 4294967040  ;;  %v21_v0 = vld [vmem:[#allocation2] sm:$0xff]  ;;  %v22_v1 = vld [vmem:[#allocation2 + $0x8] sm:$0xff]  ;;  %s105_s18 = smov [#allocation5]  }
  0x13   :  { %v25_v2 = vmul.f32 0.851, %v21_v0  ;;  %v26_v3 = vmul.f32 0.851, %v22_v1  ;;  %v23_v4 = vmul.f32 0.5, %v21_v0  ;;  %v24_v6 = vmul.f32 0.5, %v22_v1 }
  0x14   :  { %s41_s19 = sshll.u32 %s105_s18, 4  ;;  %s42_s19 = int_to_ptr.vmem [resolvable:$true] %s41_s19 }
  0x15   :  { %52 = vtanh.f32 %v25_v2  ;;  %s78_s0 = scalar_lea.vmem %s42_s19, 256  ;;  %p83_p9 = scmp.lt.s32.totalorder %s42_s19, %s42_s19 }
  0x16   :  { %54 = vtanh.f32 %v26_v3  ;;  %p79_p8 = scmp.ne.s32.totalorder %s42_s19, %s78_s0  ;;  %p84_p10 = scmp.lt.s32.totalorder %s78_s0, %s78_s0 }
  0x18   :  { %p85_p11 = por %p84_p10, %p83_p9 }
  0x1a   :  { %p86_p12 = pnand %p85_p11, %p79_p8 }
  0x1f   :  { %v53_v5 = vpop.eup %52 }
  0x20   :  { %v55_v7 = vpop.eup %54  ;;  %v29_v8 = vadd.f32 1.0, %v53_v5 }
  0x21   :  { %v30_v9 = vadd.f32 1.0, %v55_v7 }
  0x22   :  { %v31_v10 = vmul.f32 %v29_v8, %v23_v4 }
  0x23   :  { %v32_v11 = vmul.f32 %v30_v9, %v24_v6 }
  0x24   :  { %33 = vst [vmem:[#allocation5] sm:$0xff] %v31_v10 }
  0x25   :  { %34 = vst [vmem:[#allocation5 + $0x8] sm:$0xff] %v32_v11 }
  0x26   :  { %89 = shalt.err (!%p86_p12)
}
  0x27   :  { %s90_s22 = scalar_lea.hbm %s141_s1, 256 }
  0x28   :  { %p91_p13 = scmp.ne.s32.totalorder %s141_s1, %s90_s22  ;;  %p94_p0 = scmp.lt.u32.totalorder %s90_s22, %s141_s1 }
  0x2a   :  { %p96_p1 = pnand %p94_p0, %p91_p13 }
  0x2c   :  { %99 = shalt.err (!%p96_p1)
}
  0x2d   :  { %44 = dma.vmem_to_hbm [thread:$0]  %s42_s19, 256, %s141_s1, [#allocation4]  }
  0x2e   :  { %102 = dma.done.wait [#allocation4], 256  }
  0x2f   :  { %103 = vsyncadd [#allocation4], 4294967040 }
  0x30   :  { %48 = vsyncpa [#allocation3], 1 }
  0x31   :  { %49 = vsyncpa [#allocation4], 1 }

</bundles_post_ra>
